<compile_context>
chip_gen: v5e
topology: v5e:2x2
jax: 0.10.0
libtpu: 0.0.40
codegen_flags: <defaults>
</compile_context>

<pallas_src>
import math
import jax
import jax.numpy as jnp
from jax.experimental import pallas as pl
from jax.experimental.pallas import tpu as pltpu

# ------------------------------ small config ------------------------------
B = 2                 # batch
N = 16                # max_node_num
F = 8                 # max_feat_num (nfeat)
NHID = 16             # nhid
DEPTH = 3             # number of DenseGCNConv layers
FDIM = F + DEPTH * NHID          # 8 + 48 = 56
H1 = 2 * FDIM                    # `final` MLP hidden = 112
EH = 2 * N                       # `final_with_eigen` hidden = 32


# ============================== fused kernel ==============================
def _score_a_eigen_kernel(x_ref, adj_ref, flags_ref, la_ref,
                          wg0_ref, bg0_ref, wg1_ref, bg1_ref, wg2_ref, bg2_ref,
                          w1x_ref, w1h1_ref, w1h2_ref, w1h3_ref, b1_ref,
                          w2_ref, b2_ref, w3_ref, b3_ref,
                          we1x_ref, we1l_ref, be1_ref, we2_ref, be2_ref,
                          out_ref):
    f32 = jnp.float32
    x = x_ref[0].astype(f32)           # [N, F]
    adj = adj_ref[0].astype(f32)       # [N, N]
    flags = flags_ref[0].astype(f32)   # [N, 1]
    la = la_ref[0].astype(f32)         # [1, N]
    n = adj.shape[0]

    # ---- DenseGCNConv shared normalized adjacency (self-loop diagonal SET to 1) ----
    rows = jax.lax.broadcasted_iota(jnp.int32, (n, n), 0)
    cols = jax.lax.broadcasted_iota(jnp.int32, (n, n), 1)
    eye = (rows == cols).astype(f32)
    adj_hat = adj * (1.0 - eye) + eye                                   # diag := 1
    deg = jnp.maximum(jnp.sum(adj_hat, axis=-1, keepdims=True), 1.0)    # [N,1], clamp(min=1)
    dis = jax.lax.rsqrt(deg)                                            # [N,1]

    def gcn(h, w_ref, b_ref):
        # D^-1/2 (A+I) D^-1/2 (h W) + b, then tanh (module activation)
        m = jnp.dot(h, w_ref[...], preferred_element_type=f32)          # [N, NHID]
        agg = jnp.dot(adj_hat, dis * m, preferred_element_type=f32)     # [N, NHID]
        return jnp.tanh(dis * agg + b_ref[...])

    h1 = gcn(x, wg0_ref, bg0_ref)
    h2 = gcn(h1, wg1_ref, bg1_ref)
    h3 = gcn(h2, wg2_ref, bg2_ref)

    def elu(t):
        return jnp.where(t > 0, t, jnp.exp(jnp.minimum(t, 0.0)) - 1.0)

    # ---- `final` MLP (3 layers, ELU).  cat([x,h1,h2,h3]) folded into split weights ----
    t1 = elu(jnp.dot(x, w1x_ref[...], preferred_element_type=f32)
             + jnp.dot(h1, w1h1_ref[...], preferred_element_type=f32)
             + jnp.dot(h2, w1h2_ref[...], preferred_element_type=f32)
             + jnp.dot(h3, w1h3_ref[...], preferred_element_type=f32)
             + b1_ref[...])                                             # [N, H1]
    t2 = elu(jnp.dot(t1, w2_ref[...], preferred_element_type=f32) + b2_ref[...])
    y = jnp.dot(t2, w3_ref[...], preferred_element_type=f32) + b3_ref[...]   # [N, F]

    # ---- mask_x + mean over valid nodes ----
    y = y * flags                                                       # [N, F]
    fsum = jnp.sum(flags, axis=0, keepdims=True)                        # [1, 1]
    fsum = jnp.where(fsum < 1e-7, 1.0, fsum)
    pooled = jnp.sum(y, axis=0, keepdims=True) / fsum                   # [1, F]

    # ---- `final_with_eigen` MLP (2 layers, ELU).  cat([pooled, la]) via split weights ----
    z = elu(jnp.dot(pooled, we1x_ref[...], preferred_element_type=f32)
            + jnp.dot(la, we1l_ref[...], preferred_element_type=f32)
            + be1_ref[...])                                             # [1, EH]
    out = jnp.dot(z, we2_ref[...], preferred_element_type=f32) + be2_ref[...]   # [1, N]

    out_ref[0] = out.astype(out_ref.dtype)


def score_network_a_eigen_forward(params, x, adj, flags, u, la):
    """x:[B,N,F], adj:[B,N,N], flags:[B,N], u:(unused), la:[B,N] -> [B,N]."""
    del u  # `u` is not used by the original forward
    b, n, f = x.shape
    flags3 = flags.reshape(b, n, 1)
    la3 = la.reshape(b, 1, n)

    fin = params['final']
    eig = params['eigen']
    weights = [
        params['gcn'][0][0], params['gcn'][0][1],
        params['gcn'][1][0], params['gcn'][1][1],
        params['gcn'][2][0], params['gcn'][2][1],
        fin['w1x'], fin['w1h1'], fin['w1h2'], fin['w1h3'], fin['b1'],
        fin['w2'], fin['b2'], fin['w3'], fin['b3'],
        eig['we1x'], eig['we1l'], eig['be1'], eig['we2'], eig['be2'],
    ]

    def wspec(a):
        nd = a.ndim
        return pl.BlockSpec(a.shape, lambda i, _nd=nd: (0,) * _nd)

    in_specs = [
        pl.BlockSpec((1, n, f), lambda i: (i, 0, 0)),   # x
        pl.BlockSpec((1, n, n), lambda i: (i, 0, 0)),   # adj
        pl.BlockSpec((1, n, 1), lambda i: (i, 0, 0)),   # flags
        pl.BlockSpec((1, 1, n), lambda i: (i, 0, 0)),   # la
    ] + [wspec(w) for w in weights]

    out = pl.pallas_call(
        _score_a_eigen_kernel,
        out_shape=jax.ShapeDtypeStruct((b, 1, n), x.dtype),
        grid_spec=pltpu.PrefetchScalarGridSpec(
            num_scalar_prefetch=0,
            grid=(b,),
            in_specs=in_specs,
            out_specs=pl.BlockSpec((1, 1, n), lambda i: (i, 0, 0))),
        compiler_params=pltpu.CompilerParams(
            dimension_semantics=("parallel",)),     # v7x: 2 TCs split the batch
    )(x, adj, flags3, la3, *weights)
    return out.reshape(b, n)


# ============================ pure-JAX reference ============================
def reference_forward(params, x, adj, flags, u, la):
    del u
    b, n, f = x.shape
    eye = jnp.eye(n, dtype=x.dtype)
    adj_hat = adj * (1.0 - eye) + eye
    deg = jnp.maximum(adj_hat.sum(-1), 1.0)
    dis = deg ** -0.5
    adj_norm = dis[:, :, None] * adj_hat * dis[:, None, :]

    def elu(t):
        return jnp.where(t > 0, t, jnp.expm1(t))

    h = x
    x_list = [x]
    for (w, bvec) in params['gcn']:
        h = jnp.tanh(jnp.einsum('bij,bjk->bik', adj_norm, h @ w) + bvec)
        x_list.append(h)
    xs = jnp.concatenate(x_list, axis=-1)                               # [B,N,FDIM]

    fin = params['final']
    w1 = jnp.concatenate([fin['w1x'], fin['w1h1'], fin['w1h2'], fin['w1h3']], axis=0)
    t1 = elu(xs @ w1 + fin['b1'])
    t2 = elu(t1 @ fin['w2'] + fin['b2'])
    y = t2 @ fin['w3'] + fin['b3']                                      # [B,N,F]

    y = y * flags[:, :, None]
    fsum = flags.sum(1, keepdims=True)
    fsum = jnp.where(fsum < 1e-7, 1.0, fsum)
    pooled = y.sum(1) / fsum                                            # [B,F]

    eig = params['eigen']
    xcat = jnp.concatenate([pooled, la], axis=-1)
    we1 = jnp.concatenate([eig['we1x'], eig['we1l']], axis=0)
    z = elu(xcat @ we1 + eig['be1'])
    return z @ eig['we2'] + eig['be2']                                  # [B,N]


# ================================ parameters ================================
def _init_linear(key, fan_in, fan_out):
    k1, k2 = jax.random.split(key)
    s = 1.0 / math.sqrt(fan_in)
    w = jax.random.uniform(k1, (fan_in, fan_out), jnp.float32, -s, s)
    bvec = jax.random.uniform(k2, (1, fan_out), jnp.float32, -s, s)
    return w, bvec


def init_params(key):
    keys = iter(jax.random.split(key, 32))
    p = {}
    gcn = []
    for i in range(DEPTH):
        cin = F if i == 0 else NHID
        gcn.append(_init_linear(next(keys), cin, NHID))
    p['gcn'] = gcn

    s1 = 1.0 / math.sqrt(FDIM)
    def u(k, shape, s): return jax.random.uniform(k, shape, jnp.float32, -s, s)
    fin = {
        'w1x':  u(next(keys), (F, H1), s1),
        'w1h1': u(next(keys), (NHID, H1), s1),
        'w1h2': u(next(keys), (NHID, H1), s1),
        'w1h3': u(next(keys), (NHID, H1), s1),
        'b1':   u(next(keys), (1, H1), s1),
    }
    fin['w2'], fin['b2'] = _init_linear(next(keys), H1, H1)
    fin['w3'], fin['b3'] = _init_linear(next(keys), H1, F)
    p['final'] = fin

    s2 = 1.0 / math.sqrt(F + N)
    eig = {
        'we1x': u(next(keys), (F, EH), s2),
        'we1l': u(next(keys), (N, EH), s2),
        'be1':  u(next(keys), (1, EH), s2),
    }
    eig['we2'], eig['be2'] = _init_linear(next(keys), EH, N)
    p['eigen'] = eig
    return p


# ==================================== main ====================================
if __name__ == "__main__":
    key = jax.random.PRNGKey(0)
    ks = jax.random.split(key, 8)

    # node-validity flags: batch 0 has all 16 nodes, batch 1 has 12
    n_valid = jnp.array([N, 12])
    flags = (jnp.arange(N)[None, :] < n_valid[:, None]).astype(jnp.float32)   # [B,N]

    x = jax.random.normal(ks[0], (B, N, F), jnp.float32) * flags[:, :, None]
    a = jax.random.uniform(ks[1], (B, N, N))
    adj = (a < 0.3).astype(jnp.float32)
    adj = jnp.triu(adj, k=1)
    adj = adj + jnp.transpose(adj, (0, 2, 1))
    adj = adj * flags[:, :, None] * flags[:, None, :]                         # [B,N,N]
    u_in = jax.random.normal(ks[2], (B, N, N), jnp.float32)                   # unused by forward
    la = jax.random.normal(ks[3], (B, N), jnp.float32)                        # eigenvalues

    params = init_params(jax.random.PRNGKey(0))

    fwd = jax.jit(score_network_a_eigen_forward)
    out = fwd(params, x, adj, flags, u_in, la)
    out = jax.block_until_ready(out)

    assert out.shape == (B, N), out.shape
    assert bool(jnp.all(jnp.isfinite(out)))

    # correctness vs. pure-JAX reference (loose tolerance: MXU matmul precision)
    ref = reference_forward(params, x, adj, flags, u_in, la)
    max_err = float(jnp.max(jnp.abs(out - ref)))
    assert max_err < 5e-2, f"max abs err vs reference: {max_err}"

    print("KERNEL_OK")
</pallas_src>

<mosaic_0001>
module attributes {stable_mosaic.version = 11 : i64} {
  func.func @_score_a_eigen_kernel(%arg0: i32, %arg1: memref<1x16x8xf32, #tpu.memory_space<vmem>>, %arg2: memref<1x16x16xf32, #tpu.memory_space<vmem>>, %arg3: memref<1x16x1xf32, #tpu.memory_space<vmem>>, %arg4: memref<1x1x16xf32, #tpu.memory_space<vmem>>, %arg5: memref<8x16xf32, #tpu.memory_space<vmem>>, %arg6: memref<1x16xf32, #tpu.memory_space<vmem>>, %arg7: memref<16x16xf32, #tpu.memory_space<vmem>>, %arg8: memref<1x16xf32, #tpu.memory_space<vmem>>, %arg9: memref<16x16xf32, #tpu.memory_space<vmem>>, %arg10: memref<1x16xf32, #tpu.memory_space<vmem>>, %arg11: memref<8x112xf32, #tpu.memory_space<vmem>>, %arg12: memref<16x112xf32, #tpu.memory_space<vmem>>, %arg13: memref<16x112xf32, #tpu.memory_space<vmem>>, %arg14: memref<16x112xf32, #tpu.memory_space<vmem>>, %arg15: memref<1x112xf32, #tpu.memory_space<vmem>>, %arg16: memref<112x112xf32, #tpu.memory_space<vmem>>, %arg17: memref<1x112xf32, #tpu.memory_space<vmem>>, %arg18: memref<112x8xf32, #tpu.memory_space<vmem>>, %arg19: memref<1x8xf32, #tpu.memory_space<vmem>>, %arg20: memref<8x32xf32, #tpu.memory_space<vmem>>, %arg21: memref<16x32xf32, #tpu.memory_space<vmem>>, %arg22: memref<1x32xf32, #tpu.memory_space<vmem>>, %arg23: memref<32x16xf32, #tpu.memory_space<vmem>>, %arg24: memref<1x16xf32, #tpu.memory_space<vmem>>, %arg25: memref<1x1x16xf32, #tpu.memory_space<vmem>>) attributes {dimension_semantics = [#tpu.dimension_semantics<parallel>], iteration_bounds = array<i64: 2>, scalar_prefetch = 0 : i64, scratch_operands = 0 : i64, tpu.core_type = #tpu.core_type<tc>, window_params = [{transform_indices = @transform_0, window_bounds = array<i64: 1, 16, 8>}, {transform_indices = @transform_1, window_bounds = array<i64: 1, 16, 16>}, {transform_indices = @transform_2, window_bounds = array<i64: 1, 16, 1>}, {transform_indices = @transform_3, window_bounds = array<i64: 1, 1, 16>}, {pipeline_mode = #tpu.pipeline_mode<synchronous>, transform_indices = @transform_4, window_bounds = array<i64: 8, 16>}, {pipeline_mode = #tpu.pipeline_mode<synchronous>, transform_indices = @transform_5, window_bounds = array<i64: 1, 16>}, {pipeline_mode = #tpu.pipeline_mode<synchronous>, transform_indices = @transform_6, window_bounds = array<i64: 16, 16>}, {pipeline_mode = #tpu.pipeline_mode<synchronous>, transform_indices = @transform_7, window_bounds = array<i64: 1, 16>}, {pipeline_mode = #tpu.pipeline_mode<synchronous>, transform_indices = @transform_8, window_bounds = array<i64: 16, 16>}, {pipeline_mode = #tpu.pipeline_mode<synchronous>, transform_indices = @transform_9, window_bounds = array<i64: 1, 16>}, {pipeline_mode = #tpu.pipeline_mode<synchronous>, transform_indices = @transform_10, window_bounds = array<i64: 8, 112>}, {pipeline_mode = #tpu.pipeline_mode<synchronous>, transform_indices = @transform_11, window_bounds = array<i64: 16, 112>}, {pipeline_mode = #tpu.pipeline_mode<synchronous>, transform_indices = @transform_12, window_bounds = array<i64: 16, 112>}, {pipeline_mode = #tpu.pipeline_mode<synchronous>, transform_indices = @transform_13, window_bounds = array<i64: 16, 112>}, {pipeline_mode = #tpu.pipeline_mode<synchronous>, transform_indices = @transform_14, window_bounds = array<i64: 1, 112>}, {pipeline_mode = #tpu.pipeline_mode<synchronous>, transform_indices = @transform_15, window_bounds = array<i64: 112, 112>}, {pipeline_mode = #tpu.pipeline_mode<synchronous>, transform_indices = @transform_16, window_bounds = array<i64: 1, 112>}, {pipeline_mode = #tpu.pipeline_mode<synchronous>, transform_indices = @transform_17, window_bounds = array<i64: 112, 8>}, {pipeline_mode = #tpu.pipeline_mode<synchronous>, transform_indices = @transform_18, window_bounds = array<i64: 1, 8>}, {pipeline_mode = #tpu.pipeline_mode<synchronous>, transform_indices = @transform_19, window_bounds = array<i64: 8, 32>}, {pipeline_mode = #tpu.pipeline_mode<synchronous>, transform_indices = @transform_20, window_bounds = array<i64: 16, 32>}, {pipeline_mode = #tpu.pipeline_mode<synchronous>, transform_indices = @transform_21, window_bounds = array<i64: 1, 32>}, {pipeline_mode = #tpu.pipeline_mode<synchronous>, transform_indices = @transform_22, window_bounds = array<i64: 32, 16>}, {pipeline_mode = #tpu.pipeline_mode<synchronous>, transform_indices = @transform_23, window_bounds = array<i64: 1, 16>}, {transform_indices = @transform_24, window_bounds = array<i64: 1, 1, 16>}]} {
    %c0 = arith.constant 0 : index
    %c0_0 = arith.constant 0 : index
    %c0_1 = arith.constant 0 : index
    %0 = vector.load %arg1[%c0, %c0_0, %c0_1] : memref<1x16x8xf32, #tpu.memory_space<vmem>>, vector<1x16x8xf32>
    %1 = vector.shape_cast %0 : vector<1x16x8xf32> to vector<16x8xf32>
    %c0_2 = arith.constant 0 : index
    %c0_3 = arith.constant 0 : index
    %c0_4 = arith.constant 0 : index
    %2 = vector.load %arg2[%c0_2, %c0_3, %c0_4] : memref<1x16x16xf32, #tpu.memory_space<vmem>>, vector<1x16x16xf32>
    %3 = vector.shape_cast %2 : vector<1x16x16xf32> to vector<16x16xf32>
    %c0_5 = arith.constant 0 : index
    %c0_6 = arith.constant 0 : index
    %c0_7 = arith.constant 0 : index
    %4 = vector.load %arg3[%c0_5, %c0_6, %c0_7] : memref<1x16x1xf32, #tpu.memory_space<vmem>>, vector<1x16x1xf32>
    %5 = vector.shape_cast %4 : vector<1x16x1xf32> to vector<16x1xf32>
    %c0_8 = arith.constant 0 : index
    %c0_9 = arith.constant 0 : index
    %c0_10 = arith.constant 0 : index
    %6 = vector.load %arg4[%c0_8, %c0_9, %c0_10] : memref<1x1x16xf32, #tpu.memory_space<vmem>>, vector<1x1x16xf32>
    %7 = vector.shape_cast %6 : vector<1x1x16xf32> to vector<1x16xf32>
    %8 = tpu.iota {dimensions = array<i32: 0>} : vector<16x16xi32>
    %9 = tpu.iota {dimensions = array<i32: 1>} : vector<16x16xi32>
    %10 = arith.cmpi eq, %8, %9 : vector<16x16xi32>
    %11 = arith.extui %10 : vector<16x16xi1> to vector<16x16xi32>
    %12 = arith.sitofp %11 : vector<16x16xi32> to vector<16x16xf32>
    %cst = arith.constant 1.000000e+00 : f32
    %13 = vector.broadcast %cst : f32 to vector<16x16xf32>
    %14 = arith.subf %13, %12 : vector<16x16xf32>
    %15 = arith.mulf %3, %14 : vector<16x16xf32>
    %16 = arith.addf %15, %12 : vector<16x16xf32>
    %cst_11 = arith.constant dense<0.000000e+00> : vector<16xf32>
    %17 = vector.multi_reduction <add>, %16, %cst_11 [1] : vector<16x16xf32> to vector<16xf32>
    %18 = vector.shape_cast %17 : vector<16xf32> to vector<16x1xf32>
    %cst_12 = arith.constant 1.000000e+00 : f32
    %19 = vector.broadcast %cst_12 : f32 to vector<16x1xf32>
    %20 = arith.maximumf %18, %19 : vector<16x1xf32>
    %21 = math.rsqrt %20 : vector<16x1xf32>
    %c0_13 = arith.constant 0 : index
    %c0_14 = arith.constant 0 : index
    %22 = vector.load %arg5[%c0_13, %c0_14] : memref<8x16xf32, #tpu.memory_space<vmem>>, vector<8x16xf32>
    %cst_15 = arith.constant dense<0.000000e+00> : vector<16x16xf32>
    %23 = tpu.matmul %1, %22, %cst_15 {dimension_numbers = #tpu.dot_dimension_numbers<[1], [0], [0], [1], [0, 0, 1, 1], [], []>} : vector<16x8xf32>, vector<8x16xf32>, vector<16x16xf32> -> vector<16x16xf32>
    %24 = vector.broadcast %21 : vector<16x1xf32> to vector<16x16xf32>
    %25 = arith.mulf %24, %23 : vector<16x16xf32>
    %cst_16 = arith.constant dense<0.000000e+00> : vector<16x16xf32>
    %26 = tpu.matmul %16, %25, %cst_16 {dimension_numbers = #tpu.dot_dimension_numbers<[1], [0], [0], [1], [0, 0, 1, 1], [], []>} : vector<16x16xf32>, vector<16x16xf32>, vector<16x16xf32> -> vector<16x16xf32>
    %27 = vector.broadcast %21 : vector<16x1xf32> to vector<16x16xf32>
    %28 = arith.mulf %27, %26 : vector<16x16xf32>
    %c0_17 = arith.constant 0 : index
    %c0_18 = arith.constant 0 : index
    %29 = vector.load %arg6[%c0_17, %c0_18] : memref<1x16xf32, #tpu.memory_space<vmem>>, vector<1x16xf32>
    %30 = vector.broadcast %29 : vector<1x16xf32> to vector<16x16xf32>
    %31 = arith.addf %28, %30 : vector<16x16xf32>
    %32 = math.tanh %31 : vector<16x16xf32>
    %c0_19 = arith.constant 0 : index
    %c0_20 = arith.constant 0 : index
    %33 = vector.load %arg7[%c0_19, %c0_20] : memref<16x16xf32, #tpu.memory_space<vmem>>, vector<16x16xf32>
    %cst_21 = arith.constant dense<0.000000e+00> : vector<16x16xf32>
    %34 = tpu.matmul %32, %33, %cst_21 {dimension_numbers = #tpu.dot_dimension_numbers<[1], [0], [0], [1], [0, 0, 1, 1], [], []>} : vector<16x16xf32>, vector<16x16xf32>, vector<16x16xf32> -> vector<16x16xf32>
    %35 = vector.broadcast %21 : vector<16x1xf32> to vector<16x16xf32>
    %36 = arith.mulf %35, %34 : vector<16x16xf32>
    %cst_22 = arith.constant dense<0.000000e+00> : vector<16x16xf32>
    %37 = tpu.matmul %16, %36, %cst_22 {dimension_numbers = #tpu.dot_dimension_numbers<[1], [0], [0], [1], [0, 0, 1, 1], [], []>} : vector<16x16xf32>, vector<16x16xf32>, vector<16x16xf32> -> vector<16x16xf32>
    %38 = vector.broadcast %21 : vector<16x1xf32> to vector<16x16xf32>
    %39 = arith.mulf %38, %37 : vector<16x16xf32>
    %c0_23 = arith.constant 0 : index
    %c0_24 = arith.constant 0 : index
    %40 = vector.load %arg8[%c0_23, %c0_24] : memref<1x16xf32, #tpu.memory_space<vmem>>, vector<1x16xf32>
    %41 = vector.broadcast %40 : vector<1x16xf32> to vector<16x16xf32>
    %42 = arith.addf %39, %41 : vector<16x16xf32>
    %43 = math.tanh %42 : vector<16x16xf32>
    %c0_25 = arith.constant 0 : index
    %c0_26 = arith.constant 0 : index
    %44 = vector.load %arg9[%c0_25, %c0_26] : memref<16x16xf32, #tpu.memory_space<vmem>>, vector<16x16xf32>
    %cst_27 = arith.constant dense<0.000000e+00> : vector<16x16xf32>
    %45 = tpu.matmul %43, %44, %cst_27 {dimension_numbers = #tpu.dot_dimension_numbers<[1], [0], [0], [1], [0, 0, 1, 1], [], []>} : vector<16x16xf32>, vector<16x16xf32>, vector<16x16xf32> -> vector<16x16xf32>
    %46 = vector.broadcast %21 : vector<16x1xf32> to vector<16x16xf32>
    %47 = arith.mulf %46, %45 : vector<16x16xf32>
    %cst_28 = arith.constant dense<0.000000e+00> : vector<16x16xf32>
    %48 = tpu.matmul %16, %47, %cst_28 {dimension_numbers = #tpu.dot_dimension_numbers<[1], [0], [0], [1], [0, 0, 1, 1], [], []>} : vector<16x16xf32>, vector<16x16xf32>, vector<16x16xf32> -> vector<16x16xf32>
    %49 = vector.broadcast %21 : vector<16x1xf32> to vector<16x16xf32>
    %50 = arith.mulf %49, %48 : vector<16x16xf32>
    %c0_29 = arith.constant 0 : index
    %c0_30 = arith.constant 0 : index
    %51 = vector.load %arg10[%c0_29, %c0_30] : memref<1x16xf32, #tpu.memory_space<vmem>>, vector<1x16xf32>
    %52 = vector.broadcast %51 : vector<1x16xf32> to vector<16x16xf32>
    %53 = arith.addf %50, %52 : vector<16x16xf32>
    %54 = math.tanh %53 : vector<16x16xf32>
    %c0_31 = arith.constant 0 : index
    %c0_32 = arith.constant 0 : index
    %55 = vector.load %arg11[%c0_31, %c0_32] : memref<8x112xf32, #tpu.memory_space<vmem>>, vector<8x112xf32>
    %cst_33 = arith.constant dense<0.000000e+00> : vector<16x112xf32>
    %56 = tpu.matmul %1, %55, %cst_33 {dimension_numbers = #tpu.dot_dimension_numbers<[1], [0], [0], [1], [0, 0, 1, 1], [], []>} : vector<16x8xf32>, vector<8x112xf32>, vector<16x112xf32> -> vector<16x112xf32>
    %c0_34 = arith.constant 0 : index
    %c0_35 = arith.constant 0 : index
    %57 = vector.load %arg12[%c0_34, %c0_35] : memref<16x112xf32, #tpu.memory_space<vmem>>, vector<16x112xf32>
    %cst_36 = arith.constant dense<0.000000e+00> : vector<16x112xf32>
    %58 = tpu.matmul %32, %57, %cst_36 {dimension_numbers = #tpu.dot_dimension_numbers<[1], [0], [0], [1], [0, 0, 1, 1], [], []>} : vector<16x16xf32>, vector<16x112xf32>, vector<16x112xf32> -> vector<16x112xf32>
    %59 = arith.addf %56, %58 : vector<16x112xf32>
    %c0_37 = arith.constant 0 : index
    %c0_38 = arith.constant 0 : index
    %60 = vector.load %arg13[%c0_37, %c0_38] : memref<16x112xf32, #tpu.memory_space<vmem>>, vector<16x112xf32>
    %cst_39 = arith.constant dense<0.000000e+00> : vector<16x112xf32>
    %61 = tpu.matmul %43, %60, %cst_39 {dimension_numbers = #tpu.dot_dimension_numbers<[1], [0], [0], [1], [0, 0, 1, 1], [], []>} : vector<16x16xf32>, vector<16x112xf32>, vector<16x112xf32> -> vector<16x112xf32>
    %62 = arith.addf %59, %61 : vector<16x112xf32>
    %c0_40 = arith.constant 0 : index
    %c0_41 = arith.constant 0 : index
    %63 = vector.load %arg14[%c0_40, %c0_41] : memref<16x112xf32, #tpu.memory_space<vmem>>, vector<16x112xf32>
    %cst_42 = arith.constant dense<0.000000e+00> : vector<16x112xf32>
    %64 = tpu.matmul %54, %63, %cst_42 {dimension_numbers = #tpu.dot_dimension_numbers<[1], [0], [0], [1], [0, 0, 1, 1], [], []>} : vector<16x16xf32>, vector<16x112xf32>, vector<16x112xf32> -> vector<16x112xf32>
    %65 = arith.addf %62, %64 : vector<16x112xf32>
    %c0_43 = arith.constant 0 : index
    %c0_44 = arith.constant 0 : index
    %66 = vector.load %arg15[%c0_43, %c0_44] : memref<1x112xf32, #tpu.memory_space<vmem>>, vector<1x112xf32>
    %67 = vector.broadcast %66 : vector<1x112xf32> to vector<16x112xf32>
    %68 = arith.addf %65, %67 : vector<16x112xf32>
    %cst_45 = arith.constant 0.000000e+00 : f32
    %69 = vector.broadcast %cst_45 : f32 to vector<16x112xf32>
    %70 = arith.cmpf ogt, %68, %69 : vector<16x112xf32>
    %cst_46 = arith.constant 0.000000e+00 : f32
    %71 = vector.broadcast %cst_46 : f32 to vector<16x112xf32>
    %72 = arith.minimumf %68, %71 : vector<16x112xf32>
    %73 = math.exp %72 : vector<16x112xf32>
    %cst_47 = arith.constant 1.000000e+00 : f32
    %74 = vector.broadcast %cst_47 : f32 to vector<16x112xf32>
    %75 = arith.subf %73, %74 : vector<16x112xf32>
    %76 = arith.select %70, %68, %75 : vector<16x112xi1>, vector<16x112xf32>
    %c0_48 = arith.constant 0 : index
    %c0_49 = arith.constant 0 : index
    %77 = vector.load %arg16[%c0_48, %c0_49] : memref<112x112xf32, #tpu.memory_space<vmem>>, vector<112x112xf32>
    %cst_50 = arith.constant dense<0.000000e+00> : vector<16x112xf32>
    %78 = tpu.matmul %76, %77, %cst_50 {dimension_numbers = #tpu.dot_dimension_numbers<[1], [0], [0], [1], [0, 0, 1, 1], [], []>} : vector<16x112xf32>, vector<112x112xf32>, vector<16x112xf32> -> vector<16x112xf32>
    %c0_51 = arith.constant 0 : index
    %c0_52 = arith.constant 0 : index
    %79 = vector.load %arg17[%c0_51, %c0_52] : memref<1x112xf32, #tpu.memory_space<vmem>>, vector<1x112xf32>
    %80 = vector.broadcast %79 : vector<1x112xf32> to vector<16x112xf32>
    %81 = arith.addf %78, %80 : vector<16x112xf32>
    %cst_53 = arith.constant 0.000000e+00 : f32
    %82 = vector.broadcast %cst_53 : f32 to vector<16x112xf32>
    %83 = arith.cmpf ogt, %81, %82 : vector<16x112xf32>
    %cst_54 = arith.constant 0.000000e+00 : f32
    %84 = vector.broadcast %cst_54 : f32 to vector<16x112xf32>
    %85 = arith.minimumf %81, %84 : vector<16x112xf32>
    %86 = math.exp %85 : vector<16x112xf32>
    %cst_55 = arith.constant 1.000000e+00 : f32
    %87 = vector.broadcast %cst_55 : f32 to vector<16x112xf32>
    %88 = arith.subf %86, %87 : vector<16x112xf32>
    %89 = arith.select %83, %81, %88 : vector<16x112xi1>, vector<16x112xf32>
    %c0_56 = arith.constant 0 : index
    %c0_57 = arith.constant 0 : index
    %90 = vector.load %arg18[%c0_56, %c0_57] : memref<112x8xf32, #tpu.memory_space<vmem>>, vector<112x8xf32>
    %cst_58 = arith.constant dense<0.000000e+00> : vector<16x8xf32>
    %91 = tpu.matmul %89, %90, %cst_58 {dimension_numbers = #tpu.dot_dimension_numbers<[1], [0], [0], [1], [0, 0, 1, 1], [], []>} : vector<16x112xf32>, vector<112x8xf32>, vector<16x8xf32> -> vector<16x8xf32>
    %c0_59 = arith.constant 0 : index
    %c0_60 = arith.constant 0 : index
    %92 = vector.load %arg19[%c0_59, %c0_60] : memref<1x8xf32, #tpu.memory_space<vmem>>, vector<1x8xf32>
    %93 = vector.broadcast %92 : vector<1x8xf32> to vector<16x8xf32>
    %94 = arith.addf %91, %93 : vector<16x8xf32>
    %95 = vector.broadcast %5 : vector<16x1xf32> to vector<16x8xf32>
    %96 = arith.mulf %94, %95 : vector<16x8xf32>
    %cst_61 = arith.constant dense<0.000000e+00> : vector<1xf32>
    %97 = vector.multi_reduction <add>, %5, %cst_61 [0] : vector<16x1xf32> to vector<1xf32>
    %98 = vector.shape_cast %97 : vector<1xf32> to vector<1x1xf32>
    %cst_62 = arith.constant 1.000000e-07 : f32
    %99 = vector.broadcast %cst_62 : f32 to vector<1x1xf32>
    %100 = arith.cmpf olt, %98, %99 : vector<1x1xf32>
    %cst_63 = arith.constant 1.000000e+00 : f32
    %101 = vector.broadcast %cst_63 : f32 to vector<1x1xf32>
    %102 = arith.select %100, %101, %98 : vector<1x1xi1>, vector<1x1xf32>
    %cst_64 = arith.constant dense<0.000000e+00> : vector<8xf32>
    %103 = vector.multi_reduction <add>, %96, %cst_64 [0] : vector<16x8xf32> to vector<8xf32>
    %104 = vector.shape_cast %103 : vector<8xf32> to vector<1x8xf32>
    %105 = vector.broadcast %102 : vector<1x1xf32> to vector<1x8xf32>
    %106 = arith.divf %104, %105 : vector<1x8xf32>
    %c0_65 = arith.constant 0 : index
    %c0_66 = arith.constant 0 : index
    %107 = vector.load %arg20[%c0_65, %c0_66] : memref<8x32xf32, #tpu.memory_space<vmem>>, vector<8x32xf32>
    %cst_67 = arith.constant dense<0.000000e+00> : vector<1x32xf32>
    %108 = tpu.matmul %106, %107, %cst_67 {dimension_numbers = #tpu.dot_dimension_numbers<[1], [0], [0], [1], [0, 0, 1, 1], [], []>} : vector<1x8xf32>, vector<8x32xf32>, vector<1x32xf32> -> vector<1x32xf32>
    %c0_68 = arith.constant 0 : index
    %c0_69 = arith.constant 0 : index
    %109 = vector.load %arg21[%c0_68, %c0_69] : memref<16x32xf32, #tpu.memory_space<vmem>>, vector<16x32xf32>
    %cst_70 = arith.constant dense<0.000000e+00> : vector<1x32xf32>
    %110 = tpu.matmul %7, %109, %cst_70 {dimension_numbers = #tpu.dot_dimension_numbers<[1], [0], [0], [1], [0, 0, 1, 1], [], []>} : vector<1x16xf32>, vector<16x32xf32>, vector<1x32xf32> -> vector<1x32xf32>
    %111 = arith.addf %108, %110 : vector<1x32xf32>
    %c0_71 = arith.constant 0 : index
    %c0_72 = arith.constant 0 : index
    %112 = vector.load %arg22[%c0_71, %c0_72] : memref<1x32xf32, #tpu.memory_space<vmem>>, vector<1x32xf32>
    %113 = arith.addf %111, %112 : vector<1x32xf32>
    %cst_73 = arith.constant 0.000000e+00 : f32
    %114 = vector.broadcast %cst_73 : f32 to vector<1x32xf32>
    %115 = arith.cmpf ogt, %113, %114 : vector<1x32xf32>
    %cst_74 = arith.constant 0.000000e+00 : f32
    %116 = vector.broadcast %cst_74 : f32 to vector<1x32xf32>
    %117 = arith.minimumf %113, %116 : vector<1x32xf32>
    %118 = math.exp %117 : vector<1x32xf32>
    %cst_75 = arith.constant 1.000000e+00 : f32
    %119 = vector.broadcast %cst_75 : f32 to vector<1x32xf32>
    %120 = arith.subf %118, %119 : vector<1x32xf32>
    %121 = arith.select %115, %113, %120 : vector<1x32xi1>, vector<1x32xf32>
    %c0_76 = arith.constant 0 : index
    %c0_77 = arith.constant 0 : index
    %122 = vector.load %arg23[%c0_76, %c0_77] : memref<32x16xf32, #tpu.memory_space<vmem>>, vector<32x16xf32>
    %cst_78 = arith.constant dense<0.000000e+00> : vector<1x16xf32>
    %123 = tpu.matmul %121, %122, %cst_78 {dimension_numbers = #tpu.dot_dimension_numbers<[1], [0], [0], [1], [0, 0, 1, 1], [], []>} : vector<1x32xf32>, vector<32x16xf32>, vector<1x16xf32> -> vector<1x16xf32>
    %c0_79 = arith.constant 0 : index
    %c0_80 = arith.constant 0 : index
    %124 = vector.load %arg24[%c0_79, %c0_80] : memref<1x16xf32, #tpu.memory_space<vmem>>, vector<1x16xf32>
    %125 = arith.addf %123, %124 : vector<1x16xf32>
    %c0_81 = arith.constant 0 : index
    %c0_82 = arith.constant 0 : index
    %c0_83 = arith.constant 0 : index
    %126 = vector.load %arg25[%c0_81, %c0_82, %c0_83] : memref<1x1x16xf32, #tpu.memory_space<vmem>>, vector<1x1x16xf32>
    %127 = vector.shape_cast %126 : vector<1x1x16xf32> to vector<1x16xf32>
    %128 = vector.shape_cast %125 : vector<1x16xf32> to vector<1x1x16xf32>
    tpu.vector_store %arg25[%c0_81, %c0_82, %c0_83], %128 {strides = array<i32>} : memref<1x1x16xf32, #tpu.memory_space<vmem>>, vector<1x1x16xf32>,
    return
  }
  func.func @transform_0(%arg0: i32) -> (i32, i32, i32) {
    %c0_i32 = arith.constant 0 : i32
    %c0_i32_0 = arith.constant 0 : i32
    %c0_i32_1 = arith.constant 0 : i32
    return %arg0, %c0_i32, %c0_i32_0 : i32, i32, i32
  }
  func.func @transform_1(%arg0: i32) -> (i32, i32, i32) {
    %c0_i32 = arith.constant 0 : i32
    %c0_i32_0 = arith.constant 0 : i32
    %c0_i32_1 = arith.constant 0 : i32
    return %arg0, %c0_i32, %c0_i32_0 : i32, i32, i32
  }
  func.func @transform_2(%arg0: i32) -> (i32, i32, i32) {
    %c0_i32 = arith.constant 0 : i32
    %c0_i32_0 = arith.constant 0 : i32
    %c0_i32_1 = arith.constant 0 : i32
    return %arg0, %c0_i32, %c0_i32_0 : i32, i32, i32
  }
  func.func @transform_3(%arg0: i32) -> (i32, i32, i32) {
    %c0_i32 = arith.constant 0 : i32
    %c0_i32_0 = arith.constant 0 : i32
    %c0_i32_1 = arith.constant 0 : i32
    return %arg0, %c0_i32, %c0_i32_0 : i32, i32, i32
  }
  func.func @transform_4(%arg0: i32) -> (i32, i32) {
    %c0_i32 = arith.constant 0 : i32
    %c0_i32_0 = arith.constant 0 : i32
    %c0_i32_1 = arith.constant 0 : i32
    return %c0_i32, %c0_i32_0 : i32, i32
  }
  func.func @transform_5(%arg0: i32) -> (i32, i32) {
    %c0_i32 = arith.constant 0 : i32
    %c0_i32_0 = arith.constant 0 : i32
    %c0_i32_1 = arith.constant 0 : i32
    return %c0_i32, %c0_i32_0 : i32, i32
  }
  func.func @transform_6(%arg0: i32) -> (i32, i32) {
    %c0_i32 = arith.constant 0 : i32
    %c0_i32_0 = arith.constant 0 : i32
    %c0_i32_1 = arith.constant 0 : i32
    return %c0_i32, %c0_i32_0 : i32, i32
  }
  func.func @transform_7(%arg0: i32) -> (i32, i32) {
    %c0_i32 = arith.constant 0 : i32
    %c0_i32_0 = arith.constant 0 : i32
    %c0_i32_1 = arith.constant 0 : i32
    return %c0_i32, %c0_i32_0 : i32, i32
  }
  func.func @transform_8(%arg0: i32) -> (i32, i32) {
    %c0_i32 = arith.constant 0 : i32
    %c0_i32_0 = arith.constant 0 : i32
    %c0_i32_1 = arith.constant 0 : i32
    return %c0_i32, %c0_i32_0 : i32, i32
  }
  func.func @transform_9(%arg0: i32) -> (i32, i32) {
    %c0_i32 = arith.constant 0 : i32
    %c0_i32_0 = arith.constant 0 : i32
    %c0_i32_1 = arith.constant 0 : i32
    return %c0_i32, %c0_i32_0 : i32, i32
  }
  func.func @transform_10(%arg0: i32) -> (i32, i32) {
    %c0_i32 = arith.constant 0 : i32
    %c0_i32_0 = arith.constant 0 : i32
    %c0_i32_1 = arith.constant 0 : i32
    return %c0_i32, %c0_i32_0 : i32, i32
  }
  func.func @transform_11(%arg0: i32) -> (i32, i32) {
    %c0_i32 = arith.constant 0 : i32
    %c0_i32_0 = arith.constant 0 : i32
    %c0_i32_1 = arith.constant 0 : i32
    return %c0_i32, %c0_i32_0 : i32, i32
  }
  func.func @transform_12(%arg0: i32) -> (i32, i32) {
    %c0_i32 = arith.constant 0 : i32
    %c0_i32_0 = arith.constant 0 : i32
    %c0_i32_1 = arith.constant 0 : i32
    return %c0_i32, %c0_i32_0 : i32, i32
  }
  func.func @transform_13(%arg0: i32) -> (i32, i32) {
    %c0_i32 = arith.constant 0 : i32
    %c0_i32_0 = arith.constant 0 : i32
    %c0_i32_1 = arith.constant 0 : i32
    return %c0_i32, %c0_i32_0 : i32, i32
  }
  func.func @transform_14(%arg0: i32) -> (i32, i32) {
    %c0_i32 = arith.constant 0 : i32
    %c0_i32_0 = arith.constant 0 : i32
    %c0_i32_1 = arith.constant 0 : i32
    return %c0_i32, %c0_i32_0 : i32, i32
  }
  func.func @transform_15(%arg0: i32) -> (i32, i32) {
    %c0_i32 = arith.constant 0 : i32
    %c0_i32_0 = arith.constant 0 : i32
    %c0_i32_1 = arith.constant 0 : i32
    return %c0_i32, %c0_i32_0 : i32, i32
  }
  func.func @transform_16(%arg0: i32) -> (i32, i32) {
    %c0_i32 = arith.constant 0 : i32
    %c0_i32_0 = arith.constant 0 : i32
    %c0_i32_1 = arith.constant 0 : i32
    return %c0_i32, %c0_i32_0 : i32, i32
  }
  func.func @transform_17(%arg0: i32) -> (i32, i32) {
    %c0_i32 = arith.constant 0 : i32
    %c0_i32_0 = arith.constant 0 : i32
    %c0_i32_1 = arith.constant 0 : i32
    return %c0_i32, %c0_i32_0 : i32, i32
  }
  func.func @transform_18(%arg0: i32) -> (i32, i32) {
    %c0_i32 = arith.constant 0 : i32
    %c0_i32_0 = arith.constant 0 : i32
    %c0_i32_1 = arith.constant 0 : i32
    return %c0_i32, %c0_i32_0 : i32, i32
  }
  func.func @transform_19(%arg0: i32) -> (i32, i32) {
    %c0_i32 = arith.constant 0 : i32
    %c0_i32_0 = arith.constant 0 : i32
    %c0_i32_1 = arith.constant 0 : i32
    return %c0_i32, %c0_i32_0 : i32, i32
  }
  func.func @transform_20(%arg0: i32) -> (i32, i32) {
    %c0_i32 = arith.constant 0 : i32
    %c0_i32_0 = arith.constant 0 : i32
    %c0_i32_1 = arith.constant 0 : i32
    return %c0_i32, %c0_i32_0 : i32, i32
  }
  func.func @transform_21(%arg0: i32) -> (i32, i32) {
    %c0_i32 = arith.constant 0 : i32
    %c0_i32_0 = arith.constant 0 : i32
    %c0_i32_1 = arith.constant 0 : i32
    return %c0_i32, %c0_i32_0 : i32, i32
  }
  func.func @transform_22(%arg0: i32) -> (i32, i32) {
    %c0_i32 = arith.constant 0 : i32
    %c0_i32_0 = arith.constant 0 : i32
    %c0_i32_1 = arith.constant 0 : i32
    return %c0_i32, %c0_i32_0 : i32, i32
  }
  func.func @transform_23(%arg0: i32) -> (i32, i32) {
    %c0_i32 = arith.constant 0 : i32
    %c0_i32_0 = arith.constant 0 : i32
    %c0_i32_1 = arith.constant 0 : i32
    return %c0_i32, %c0_i32_0 : i32, i32
  }
  func.func @transform_24(%arg0: i32) -> (i32, i32, i32) {
    %c0_i32 = arith.constant 0 : i32
    %c0_i32_0 = arith.constant 0 : i32
    %c0_i32_1 = arith.constant 0 : i32
    return %arg0, %c0_i32, %c0_i32_0 : i32, i32, i32
  }
}

</mosaic_0001>

<bundles_post_ra>
// kernel: score_network_a_eigen_forward.1
= control target key start
LH: loop header
LB: loop body
LE: loop exit
PB: predicated region body
PF: predicated region fallthrough
CT: control target
= control target key end

     0   :  { %s2789_s0 = inlined_call_operand.vmem [shape: f32[2,16,8], index: 0, kind: input, shape index: {}]   ;;  %s2790_s1 = inlined_call_operand.vmem [shape: f32[2,16,16], index: 1, kind: input, shape index: {}]   ;;  %s2791_s2 = inlined_call_operand.vmem [shape: f32[2,16,1], index: 2, kind: input, shape index: {}]   ;;  %s2792_s3 = inlined_call_operand.vmem [shape: f32[2,1,16], index: 3, kind: input, shape index: {}]   ;;  %s2793_s4 = inlined_call_operand.vmem [shape: f32[8,16], index: 4, kind: input, shape index: {}]   ;;  %s2794_s5 = inlined_call_operand.vmem [shape: f32[1,16], index: 5, kind: input, shape index: {}]   ;;  %s2795_s6 = inlined_call_operand.vmem [shape: f32[16,16], index: 6, kind: input, shape index: {}]   ;;  %s2796_s7 = inlined_call_operand.vmem [shape: f32[1,16], index: 7, kind: input, shape index: {}]   ;;  %s2797_s8 = inlined_call_operand.vmem [shape: f32[16,16], index: 8, kind: input, shape index: {}]   ;;  %s2798_s9 = inlined_call_operand.vmem [shape: f32[1,16], index: 9, kind: input, shape index: {}]   ;;  %s2799_s10 = inlined_call_operand.hbm [shape: f32[8,112], index: 10, kind: input, shape index: {}]   ;;  %s2800_s11 = inlined_call_operand.vmem [shape: f32[16,112], index: 11, kind: input, shape index: {}]   ;;  %s2801_s12 = inlined_call_operand.vmem [shape: f32[16,112], index: 12, kind: input, shape index: {}]   ;;  %s2802_s13 = inlined_call_operand.vmem [shape: f32[16,112], index: 13, kind: input, shape index: {}]   ;;  %s2803_s14 = inlined_call_operand.hbm [shape: f32[1,112], index: 14, kind: input, shape index: {}]   ;;  %s2804_s15 = inlined_call_operand.vmem [shape: f32[112,112], index: 15, kind: input, shape index: {}]   ;;  %s2805_s16 = inlined_call_operand.hbm [shape: f32[1,112], index: 16, kind: input, shape index: {}]   ;;  %s2806_s17 = inlined_call_operand.vmem [shape: f32[112,8], index: 17, kind: input, shape index: {}]   ;;  %s2807_s18 = inlined_call_operand.hbm [shape: f32[1,8], index: 18, kind: input, shape index: {}]   ;;  %s2808_s19 = inlined_call_operand.hbm [shape: f32[8,32], index: 19, kind: input, shape index: {}]   ;;  %s2809_s20 = inlined_call_operand.hbm [shape: f32[16,32], index: 20, kind: input, shape index: {}]   ;;  %s2810_s21 = inlined_call_operand.hbm [shape: f32[1,32], index: 21, kind: input, shape index: {}]   ;;  %s2811_s22 = inlined_call_operand.vmem [shape: f32[32,16], index: 22, kind: input, shape index: {}]   ;;  %s2812_s23 = inlined_call_operand.hbm [shape: f32[1,16], index: 23, kind: input, shape index: {}]   ;;  %s2813_s24 = inlined_call_operand.hbm [shape: f32[2,1,16], index: 24, kind: output, shape index: {}]  }
   0x1   :  { %2825 = sst [smem:[#allocation30_spill]] %s2789_s0 }
   0x2   :  { %2826 = sst [smem:[#allocation31_spill]] %s2790_s1 }
   0x3   :  { %2827 = sst [smem:[#allocation32_spill]] %s2791_s2 }
   0x4   :  { %2828 = sst [smem:[#allocation33_spill]] %s2792_s3 }
   0x5   :  { %2829 = sst [smem:[#allocation34_spill]] %s2793_s4 }
   0x6   :  { %2830 = sst [smem:[#allocation35_spill]] %s2794_s5 }
   0x7   :  { %2831 = sst [smem:[#allocation36_spill]] %s2795_s6 }
   0x8   :  { %2832 = sst [smem:[#allocation37_spill]] %s2796_s7 }
   0x9   :  { %2833 = sst [smem:[#allocation38_spill]] %s2797_s8 }
   0xa   :  { %2834 = sst [smem:[#allocation39_spill]] %s2799_s10 }
   0xb   :  { %2835 = sst [smem:[#allocation40_spill]] %s2803_s14 }
   0xc   :  { %2836 = sst [smem:[#allocation41_spill]] %s2807_s18 }
   0xd   :  { %2837 = sst [smem:[#allocation42_spill]] %s2813_s24 }
   0xe   :  { %29 = vsyncpa [#allocation3], 0 }
   0xf   :  { %30 = vsyncpa [#allocation6], 0 }
  0x10   :  { %31 = vsyncpa [#allocation9], 0 }
  0x11   :  { %32 = vsyncpa [#allocation12], 0 }
  0x12   :  { %33 = vsyncpa [#allocation15], 0 }
  0x13   :  { %34 = vsyncpa [#allocation4], 0 }
  0x14   :  { %36 = vsyncpa [#allocation4 + $0x1], 0  ;;  %s2407_s5 = smov 0   ;;  %s2409_s26 = smov 0  }
  0x15   :  { %s2411_s27 = smov 0   ;;  %s2413_s28 = smov 0  }
  0x16 LB: > { %2838 = sst [smem:[#allocation23_spill]] %s2256_s5  ;;  %s2428_s6 = sadd.s32 4294967295, %s2268_s28   ;;  %s2268_s28 = sphi %s2413_s28, %s2866_s28   ;;  %s2264_s27 = sphi %s2411_s27, %s2868_s27   ;;  %s2260_s26 = sphi %s2409_s26, %s2870_s26   ;;  %s2256_s5 = sphi %s2407_s5, %s2869_s5  }
  0x17   : > { %2839 = sst [smem:[#allocation24_spill]] %s2264_s27  ;;  %s1720_s2 = sadd.s32 4294967294, %s2268_s28  }
  0x18   : > { %2840 = sst [smem:[#allocation25_spill]] %s2268_s28  ;;  %s2432_s29 = sadd.s32 1, %s2268_s28  }
  0x19   : > { %2841 = sst [smem:[#allocation26_spill]] %s2432_s29  ;;  %s573_s0 = sadd.s32 1, %s2264_s27 }
  0x1a   : > { %s570_s7 = ssub.s32 %s2268_s28, %s2432_s29  ;;  %p583_p0 = scmp.ne.s32.totalorder %s2264_s27, %s2260_s26 }
  0x1b   : > { %p571_p1 = scmp.eq.s32.totalorder %s570_s7, 0  ;;  %p584_p2 = scmp.eq.s32.totalorder %s2428_s6, 1 }
  0x1c   : > { %p589_p3 = scmp.ne.s32.totalorder %s2260_s26, %s2256_s5  ;;  %p590_p4 = scmp.eq.s32.totalorder %s1720_s2, 1 }
  0x1d   : > { %s2443_s30 = scalar_select %p571_p1, %s2264_s27, %s573_s0  }
  0x1e   : > { %p2445_p5 = por %p584_p2, %p583_p0  ;;  %p2449_p6 = por %p590_p4, %p589_p3 }
  0x1f   : > { %2842 = sst [smem:[#allocation27_spill]] %s2443_s30  ;;  %p1721_p7 = scmp.ge.s32.totalorder %s2268_s28, 1 }
  0x20   : > { %s2843_s3 = scalar_select %p2445_p5, 1, 0 }
  0x21   : > { %s2845_s25 = scalar_select %p2449_p6, 1, 0 }
  0x22   : > { %2844 = sst [smem:[#allocation28_spill]] %s2843_s3  ;;  %p597_p8 = scmp.lt.s32.totalorder %s2268_s28, 3 }
  0x23   : > { %2846 = sst [smem:[#allocation29_spill]] %s2845_s25  ;;  %p1848_p9 = scmp.eq.s32.totalorder %s2428_s6, 0 }
  0x24   : > { %p2456_p10 = pnand %p1721_p7, %p597_p8  ;;  %s2848_s14 = sld [smem:[#allocation40_spill]] }
  0x25   : > { %s2270_s0 = smov [#allocation5]   ;;  %s2849_s18 = sld [smem:[#allocation41_spill]] }
  0x26   : > { %p1819_p11 = pneg %p2456_p10  ;;  %s650_s7 = sshll.u32 %s2270_s0, 4  ;;  %s651_s7 = int_to_ptr.vmem [resolvable:$true] %s650_s7 }
  0x27   : > { %s2271_s5 = smov [#allocation8]   ;;  %s2272_s27 = smov [#allocation11]  }
  0x28   : > { %p2470_p12 = pnand %p1848_p9, %p1819_p11  ;;  %s680_s0 = sshll.u32 %s2271_s5, 4  ;;  %s681_s0 = int_to_ptr.vmem [resolvable:$true] %s680_s0 }
  0x29   : > { %s703_s30 = sshll.u32 %s2272_s27, 4  ;;  %s2851_s10 = sld [smem:[#allocation39_spill]]  ;;  %s704_s30 = int_to_ptr.vmem [resolvable:$true] %s703_s30 }
  0x2a   : > { %s648_s2 = sshll.u32 %s2848_s14, 4  ;;  %s701_s14 = sshll.u32 %s2809_s20, 4  ;;  %s649_s2 = int_to_ptr.hbm [resolvable:$true] %s648_s2  ;;  %s702_s14 = int_to_ptr.hbm [resolvable:$true] %s701_s14 }
  0x2b   : > { %s678_s29 = sshll.u32 %s2849_s18, 4  ;;  %s2273_s24 = smov 128   ;;  %s679_s29 = int_to_ptr.hbm [resolvable:$true] %s678_s29 }
  0x2c   : > { %1825 = dma.hbm_to_vmem [thread:$0]  (!%p2470_p12), %s649_s2, 16, %s651_s7, [#allocation6]  }
  0x2d   : > { %1831 = dma.hbm_to_vmem [thread:$0]  (!%p2470_p12), %s679_s29, 16, %s681_s0, [#allocation9]  }
  0x2e   : > { %s2274_s4 = smov 8   ;;  %s2275_s5 = smov [#allocation2]  }
  0x2f   : > { %s627_s3 = sshll.u32 %s2851_s10, 4  ;;  %s629_s2 = sshll.u32 %s2275_s5, 4  ;;  %s628_s3 = int_to_ptr.hbm [resolvable:$true] %s627_s3  ;;  %s630_s2 = int_to_ptr.vmem [resolvable:$true] %s629_s2 }
  0x30   : > { %1837 = dma.hbm_to_vmem [thread:$0]  (!%p2470_p12), %s702_s14, 256, %s704_s30, [#allocation12], %s2273_s24, %s2273_s24, %s2274_s4  }
  0x31   : > { %s663_s29 = sshll.u32 %s2805_s16, 4  ;;  %s690_s28 = sshll.u32 %s2808_s19, 4  ;;  %s664_s29 = int_to_ptr.hbm [resolvable:$true] %s663_s29  ;;  %s691_s28 = int_to_ptr.hbm [resolvable:$true] %s690_s28 }
  0x32   : > { %1822 = dma.hbm_to_vmem [thread:$0]  (!%p2470_p12), %s628_s3, 128, %s630_s2, [#allocation3]  }
  0x33   : > { %s2276_s27 = smov [#allocation7]   ;;  %s2277_s14 = smov [#allocation10]  }
  0x34   : > { %s665_s10 = sshll.u32 %s2276_s27, 4  ;;  %s692_s24 = sshll.u32 %s2277_s14, 4  ;;  %s666_s10 = int_to_ptr.vmem [resolvable:$true] %s665_s10  ;;  %s693_s24 = int_to_ptr.vmem [resolvable:$true] %s692_s24 }
  0x35   : > { %1828 = dma.hbm_to_vmem [thread:$0]  (!%p2470_p12), %s664_s29, 16, %s666_s10, [#allocation6]  }
  0x36   : > { %s716_s5 = sshll.u32 %s2810_s21, 4  ;;  %s731_s7 = sshll.u32 %s2812_s23, 4  ;;  %s717_s5 = int_to_ptr.hbm [resolvable:$true] %s716_s5  ;;  %s732_s7 = int_to_ptr.hbm [resolvable:$true] %s731_s7 }
  0x37   : > { %1834 = dma.hbm_to_vmem [thread:$0]  (!%p2470_p12), %s691_s28, 128, %s693_s24, [#allocation9]  }
  0x38   : > { %s2278_s1 = smov [#allocation13]   ;;  %s2279_s10 = smov [#allocation14]  }
  0x39   : > { %s718_s0 = sshll.u32 %s2278_s1, 4  ;;  %s733_s29 = sshll.u32 %s2279_s10, 4  ;;  %s719_s0 = int_to_ptr.vmem [resolvable:$true] %s718_s0  ;;  %s734_s29 = int_to_ptr.vmem [resolvable:$true] %s733_s29 }
  0x3a   : > { %1840 = dma.hbm_to_vmem [thread:$0]  (!%p2470_p12), %s717_s5, 16, %s719_s0, [#allocation12]  }
  0x3b   : > { %1843 = dma.hbm_to_vmem [thread:$0]  (!%p2470_p12), %s732_s7, 16, %s734_s29, [#allocation15]  }
  0x3c   : > { %776 = sbr.rel (%p2456_p10) target bundleno = 1665 (0x681), region = 116 }
  0x41   : > { %2231 = dma.done.wait (%p1848_p9), [#allocation3], 128  }
  0x42   : > { %2233 = vsyncadd (%p1848_p9), [#allocation3], 4294967168 }
  0x43   : > { %2235 = dma.done.wait (%p1848_p9), [#allocation6], 32  }
  0x44   : > { %2237 = vsyncadd (%p1848_p9), [#allocation6], 4294967264 }
  0x45   : > { %2239 = dma.done.wait (%p1848_p9), [#allocation9], 144  }
  0x46   : > { %2241 = vsyncadd (%p1848_p9), [#allocation9], 4294967152 }
  0x47   : > { %2243 = dma.done.wait (%p1848_p9), [#allocation12], 272  }
  0x48   : > { %2245 = vsyncadd (%p1848_p9), [#allocation12], 4294967024 }
  0x49   : > { %2247 = dma.done.wait (%p1848_p9), [#allocation15], 16  }
  0x4a   : > { %2249 = vsyncadd (%p1848_p9), [#allocation15], 4294967280  ;;  %p890_p13 = scmp.lt.s32.totalorder %s2428_s6, 1  ;;  %v915_v0 = vlaneseq  ;;  %s2852_s27 = sld [smem:[#allocation31_spill]]  ;;  %v2280_v4 = vmov 0.0   ;;  %vm962_vm2 = vcmask 64512  }
  0x4b   : > { %s2853_s4 = sld [smem:[#allocation30_spill]]  ;;  %vm932_vm3 = vcmask 130048   ;;  %v1167_v44 = vld [vmem:[%s2800_s11 + $0x8] sm:$0xff]  ;;  %v1166_v45 = vld [vmem:[%s2800_s11] sm:$0xff]  ;;  %vm1310_vm10 = vcmask 916480   ;;  %vm1411_vm13 = vcmask 7168  }
  0x4c   : > { %s2532_s25 = scalar_select %p890_p13, %s2428_s6, 1  ;;  %v916_v1 = vshrl.u32 %v915_v0, 7  ;;  %v919_v2 = vand.u32 127, %v915_v0  ;;  %v1165_v59 = vld [vmem:[#allocation2] sm:$0xff]  ;;  %v1215_v62 = vld [vmem:[%s2801_s12 + $0x8] sm:$0xff] }
  0x4d   : > { %s2854_s7 = sld [smem:[#allocation34_spill]]  ;;  %v1214_v63 = vld [vmem:[%s2801_s12] sm:$0xff]  ;;  %s888_s24 = sand.u32 1, %s2260_s26  }
  0x4e   : > { %s2535_s8 = sshll.u32 %s2532_s25, 4  ;;  %v917_v3 = vadd.s32 8, %v916_v1  ;;  %vm920_vm0 = vcmp.eq.s32.totalorder %v916_v1, %v919_v2  ;;  %s2855_s10 = sld [smem:[#allocation36_spill]] }
  0x4f   : > { %v1746_v5 = vsel %vm920_vm0, 1.0, %v2280_v4  ;;  %s2858_s30 = sld [smem:[#allocation37_spill]]  ;;  %s1541_s0 = scalar_lea.sflag [#allocation4], %s888_s24 }
  0x50   : > { %s899_s14 = scalar_lea.vmem %s2852_s27, %s2535_s8  ;;  %vm921_vm1 = vcmp.eq.s32.totalorder %v917_v3, %v919_v2  ;;  %v926_v12 = vsub.f32 1.0, %v1746_v5  ;;  %s2860_s3 = sld [smem:[#allocation33_spill]] }
  0x51   : > { %s894_s5 = scalar_lea.vmem %s2853_s4, %s2535_s8  ;;  %v911_v6 = vld [vmem:[%s899_s14 + $0x8] sm:$0xff]  ;;  %v1747_v7 = vsel %vm921_vm1, 1.0, %v2280_v4  ;;  %v910_v11 = vld [vmem:[%s899_s14] sm:$0xff] }
  0x52   : > { %v2548_v9 = vld [vmem:[%s894_s5] sm:$0xff]  ;;  %v927_v10 = vsub.f32 1.0, %v1747_v7  ;;  %v928_v15 = vmul.f32 %v926_v12, %v910_v11  ;;  %v2556_v17 = vld [vmem:[%s894_s5 + $0x8] sm:$0xff]  ;;  %s2856_s5 = sld [smem:[#allocation35_spill]] }
  0x53   : > { %v961_v8 = vld [vmem:[%s2854_s7] sm:$0xff]  ;;  %s2857_s7 = sld [smem:[#allocation38_spill]] }
  0x54   : > { %984 = vmatpush.msra.mxu0 %v961_v8  ;;  %v929_v13 = vmul.f32 %v927_v10, %v911_v6  ;;  %v2558_v18 = vadd.f32 %v1746_v5, %v928_v15  ;;  %v1034_v42 = vld [vmem:[%s2855_s10 + $0x8] sm:$0xff]  ;;  %v1033_v43 = vld [vmem:[%s2855_s10] sm:$0xff] }
  0x55   : > { %1748 = vmatmul.msk.f32.vlgmr.msra.gmra.mxu0 %vm962_vm2, %v2548_v9  ;;  %1055 = vmatpush.msra.mxu2 %v1034_v42  ;;  %v1913_v0 = vld [vmem:[%s2858_s30] ss:$0 sm:$0xff]  ;;  %s2859_s30 = sld [smem:[#allocation32_spill]] }
  0x56   : > { %v2552_v14 = vadd.f32 %v1747_v7, %v929_v13  ;;  %v933_v19 = vsel %vm932_vm3, %v2558_v18, 0.0  ;;  %v1242_v13 = vld [vmem:[%s2802_s13 + $0x8] sm:$0xff]  ;;  %v1241_v15 = vld [vmem:[%s2802_s13] sm:$0xff]  ;;  %s907_s2 = scalar_lea.vmem %s2860_s3, %s2532_s25 }
  0x57   : > { %1056 = vmatpush.msra.mxu2 %v1033_v43  ;;  %v1364_v42 = vld [vmem:[%s2806_s17 + $0x60] sm:$0xff] }
  0x58   : > { %v936_v16 = vsel %vm932_vm3, %v2552_v14, 0.0  ;;  %v1912_v46 = vld [vmem:[%s2856_s5] ss:$0 sm:$0xff] }
  0x59   : > { %937 = vadd.xlane.f32.xlu0 %v936_v16  ;;  %1182 = vmatpush.msrb.mxu2 %v1167_v44  ;;  %v1100_v60 = vld [vmem:[%s2857_s7 + $0x8] sm:$0xff]  ;;  %v1099_v61 = vld [vmem:[%s2857_s7] sm:$0xff]  ;;  %v1363_v44 = vld [vmem:[%s2806_s17 + $0x58] sm:$0xff] }
  0x5a   : > { %1121 = vmatpush.msrb.mxu0 %v1100_v60  ;;  %v1305_v16 = vld [vmem:[%s2804_s15 + $0x68] sm:$0xff] }
  0x5b   : > { %1183 = vmatpush.msrb.mxu2 %v1166_v45  ;;  %s904_s4 = scalar_lea.vmem %s2859_s30, %s2535_s8  ;;  %s2861_s8 = sld [smem:[#allocation42_spill]] }
  0x5c   : > { %1122 = vmatpush.msrb.mxu0 %v1099_v61 }
  0x5d   : > { %1749 = vmatmul.msk.f32.gmra.mxu0 %vm962_vm2, %v2556_v17 }
  0x5e   : > { %1230 = vmatpush.msra.mxu0 %v1215_v62 }
  0x60   : > { %1231 = vmatpush.msra.mxu0 %v1214_v63 }
  0x61   : > { %934 = vadd.xlane.f32.xlu0 %v933_v19  ;;  %v1914_v19 = vld [vmem:[%s2798_s9] ss:$0 sm:$0xff]  ;;  %s1549_s5 = scalar_lea.hbm %s2861_s8, %s2428_s6  ;;  %s2206_s27 = scalar_lea.hbm %s2861_s8, 2 }
  0x62   : > { %s1553_s1 = sshll.u32 %s1549_s5, 4  ;;  %s1554_s1 = int_to_ptr.hbm [resolvable:$true] %s1553_s1 }
  0x63   : > { %s2200_s29 = sshra.s32 %s1554_s1, 4  ;;  %s2201_s29 = int_to_ptr.hbm [resolvable:$true] %s2200_s29 }
  0x64   : > { %s2202_s18 = scalar_lea.hbm %s2201_s29, 1  ;;  %p2207_p3 = scmp.lt.s32.totalorder %s2201_s29, %s2861_s8 }
  0x65   : > { %p2203_p0 = scmp.ne.s32.totalorder %s2201_s29, %s2202_s18  ;;  %p2208_p4 = scmp.lt.s32.totalorder %s2206_s27, %s2202_s18 }
  0x67   : > { %p2204_p1 = pnand %p2203_p0, %p2445_p5  ;;  %p2209_p7 = por %p2208_p4, %p2207_p3 }
  0x69   : > { %p2205_p2 = pneg %p2204_p1 }
  0x6b   : > { %p2210_p8 = pnand %p2209_p7, %p2205_p2 }
  0xcc   : > { %v938_v20 = vpop.xlane.xlu0 %937 }
  0xcd   : > { %v940_v21 = vmax.f32 %v938_v20, 1.0 }
  0xcf   : > { %1918 = vrsqrt.f32 %v940_v21  ;;  %vm957_vm5 = vweird.f32 %v940_v21 }
  0xd2   : > { %v986_v23 = vpop.f32.mrf.mxu0 }
  0xd4   : > { %v935_v22 = vpop.xlane.xlu0 %934 }
  0xd5   : > { %v1919_v24 = vpop.eup %1918  ;;  %v939_v25 = vmax.f32 %v935_v22, 1.0 }
  0xd6   : > { %v952_v26 = vmul.f32 %v1919_v24, %v940_v21  ;;  %vm958_vm4 = vweird.f32 %v1919_v24 }
  0xd7   : > { %1920 = vrsqrt.f32 %v939_v25  ;;  %vm959_vm6 = vmor %vm957_vm5, %vm958_vm4  ;;  %vm947_vm8 = vweird.f32 %v939_v25 }
  0xd8   : > { %v953_v27 = vmul.f32 %v1919_v24, %v952_v26 }
  0xda   : > { %v954_v28 = vmul.f32 0.5, %v953_v27  ;;  %v989_v33 = vpop.f32.mrf.mxu0 }
  0xdc   : > { %v955_v29 = vsub.f32 1.5, %v954_v28  ;;  %v1301_v28 = vld [vmem:[%s2804_s15 + $0x48] sm:$0xff] }
  0xdd   : > { %v1921_v30 = vpop.eup %1920 }
  0xde   : > { %v956_v31 = vmul.f32 %v1919_v24, %v955_v29  ;;  %v942_v32 = vmul.f32 %v1921_v30, %v939_v25  ;;  %vm948_vm7 = vweird.f32 %v1921_v30  ;;  %v1300_v29 = vld [vmem:[%s2804_s15 + $0x40] sm:$0xff] }
  0xdf   : > { %vm949_vm9 = vmor %vm947_vm8, %vm948_vm7  ;;  %vm1538_vm7 = vcmask 122880  }
  0xe0   : > { %v2564_v34 = vsel %vm959_vm6, %v1919_v24, %v956_v31  ;;  %v943_v35 = vmul.f32 %v1921_v30, %v942_v32  ;;  %v1298_v31 = vld [vmem:[%s2804_s15 + $0x30] sm:$0xff]  ;;  %v1297_v32 = vld [vmem:[%s2804_s15 + $0x28] sm:$0xff] }
  0xe1   : > { %v993_v36 = vmul.f32 %v989_v33, %v2564_v34  ;;  %v1296_v33 = vld [vmem:[%s2804_s15 + $0x20] sm:$0xff] }
  0xe2   : > { %v944_v37 = vmul.f32 0.5, %v943_v35  ;;  %v1294_v35 = vld [vmem:[%s2804_s15 + $0x10] sm:$0xff] }
  0xe3   : > { %1014 = vmatpush.msra.mxu1 %v993_v36  ;;  %v1293_v36 = vld [vmem:[%s2804_s15 + $0x8] sm:$0xff] }
  0xe4   : > { %v945_v38 = vsub.f32 1.5, %v944_v37  ;;  %v1292_v37 = vld [vmem:[%s2804_s15] sm:$0xff] }
  0xe6   : > { %v946_v39 = vmul.f32 %v1921_v30, %v945_v38 }
  0xe8   : > { %v2567_v40 = vsel %vm949_vm9, %v1921_v30, %v946_v39  ;;  %v1299_v30 = vld [vmem:[%s2804_s15 + $0x38] sm:$0xff] }
  0xe9   : > { %v992_v41 = vmul.f32 %v986_v23, %v2567_v40 }
  0xeb   : > { %1015 = vmatpush.msra.mxu1 %v992_v41  ;;  %v1365_v41 = vld [vmem:[%s2806_s17 + $0x68] sm:$0xff] }
  0xec   : > { %1750 = vmatmul.msk.f32.vlgmr.msra.gmra.mxu1 %vm932_vm3, %v2558_v18 }
  0xf4   : > { %1751 = vmatmul.msk.f32.gmra.mxu1 %vm932_vm3, %v2552_v14 }
 0x169   : > { %v1017_v47 = vpop.f32.mrf.mxu1 }
 0x16a   : > { %v1023_v48 = vmul.f32 %v1017_v47, %v2567_v40  ;;  %v1362_v47 = vld [vmem:[%s2806_s17 + $0x50] sm:$0xff] }
 0x16c   : > { %v1029_v49 = vadd.f32 %v1912_v46, %v1023_v48 }
 0x16e   : > { %1922 = vtanh.f32 %v1029_v49 }
 0x171   : > { %v1020_v50 = vpop.f32.mrf.mxu1 }
 0x172   : > { %v1024_v51 = vmul.f32 %v1020_v50, %v2564_v34  ;;  %v1361_v50 = vld [vmem:[%s2806_s17 + $0x48] sm:$0xff] }
 0x174   : > { %v1923_v52 = vpop.eup %1922  ;;  %v1030_v53 = vadd.f32 %v1912_v46, %v1024_v51  ;;  %v1915_v46 = vld [vmem:[#allocation5] ss:$0 sm:$0xff] }
 0x175   : > { %1752 = vmatmul.msk.f32.vlgmr.msra.gmra.mxu2 %vm932_vm3, %v1923_v52 }
 0x176   : > { %1924 = vtanh.f32 %v1030_v53  ;;  %1319 = vmatpush.msra.mxu2 %v1305_v16  ;;  %v912_v16 = vld [vmem:[%s904_s4] sm:$0xff] }
 0x17c   : > { %v1925_v54 = vpop.eup %1924 }
 0x17d   : > { %1753 = vmatmul.msk.f32.gmra.mxu2 %vm932_vm3, %v1925_v54 }
 0x185   : > { %1760 = vmatmul.msk.f32.vlgmr.msrb.gmra.mxu2 %vm932_vm3, %v1923_v52 }
 0x18d   : > { %1761 = vmatmul.msk.f32.gmra.mxu2 %vm932_vm3, %v1925_v54 }
 0x1f8   : > { %v1058_v55 = vpop.f32.mrf.mxu2 }
 0x1f9   : > { %v1064_v58 = vmul.f32 %v1058_v55, %v2567_v40 }
 0x200   : > { %v1061_v56 = vpop.f32.mrf.mxu2 }
 0x201   : > { %v1065_v57 = vmul.f32 %v1061_v56, %v2564_v34 }
 0x203   : > { %1080 = vmatpush.msra.mxu3 %v1065_v57 }
 0x205   : > { %1081 = vmatpush.msra.mxu3 %v1064_v58 }
 0x206   : > { %1754 = vmatmul.msk.f32.vlgmr.msra.gmra.mxu3 %vm932_vm3, %v2558_v18 }
 0x207   : > { %1206 = vmatpush.msrb.mxu3 %v1165_v59 }
 0x208   : > { %v1185_v39 = vpop.f32.mrf.mxu2 }
 0x209   : > { %1378 = vmatpush.msra.mxu3 %v1365_v41 }
 0x20b   : > { %1379 = vmatpush.msra.mxu3 %v1364_v42 }
 0x20d   : > { %1380 = vmatpush.msra.mxu3 %v1363_v44 }
 0x20e   : > { %1755 = vmatmul.msk.f32.gmra.mxu3 %vm932_vm3, %v2552_v14 }
 0x20f   : > { %1381 = vmatpush.msra.mxu3 %v1362_v47  ;;  %v914_v47 = vld [vmem:[%s907_s2] sm:$0x1]  ;;  %s889_s2 = scalar_lea.vmem [#allocation16], %s888_s24 }
 0x210   : > { %v1188_v53 = vpop.f32.mrf.mxu2  ;;  %s1551_s25 = sshll.u32 %s889_s2, 4  ;;  %s1552_s25 = int_to_ptr.vmem [resolvable:$true] %s1551_s25 }
 0x211   : > { %1382 = vmatpush.msra.mxu3 %v1361_v50  ;;  %v1917_v50 = vld [vmem:[#allocation8] ss:$0 sm:$0xff] }
 0x216   : > { %1762 = vmatmul.msk.f32.vlgmr.msrb.gmra.mxu3 %vm962_vm2, %v2548_v9 }
 0x21e   : > { %1763 = vmatmul.msk.f32.gmra.mxu3 %vm962_vm2, %v2556_v17  ;;  %v1304_v17 = vld [vmem:[%s2804_s15 + $0x60] sm:$0xff] }
 0x21f   : > { %1320 = vmatpush.msra.mxu2 %v1304_v17  ;;  %v913_v17 = vld [vmem:[%s904_s4 + $0x8] sm:$0xff] }
 0x289   : > { %v1083_v1 = vpop.f32.mrf.mxu3 }
 0x28a   : > { %v1089_v2 = vmul.f32 %v1083_v1, %v2567_v40 }
 0x28c   : > { %v1095_v3 = vadd.f32 %v1913_v0, %v1089_v2 }
 0x28e   : > { %1926 = vtanh.f32 %v1095_v3 }
 0x291   : > { %v1086_v4 = vpop.f32.mrf.mxu3 }
 0x292   : > { %v1090_v5 = vmul.f32 %v1086_v4, %v2564_v34 }
 0x294   : > { %v1927_v6 = vpop.eup %1926  ;;  %v1096_v7 = vadd.f32 %v1913_v0, %v1090_v5 }
 0x295   : > { %1756 = vmatmul.msk.f32.vlgmr.msrb.gmra.mxu0 %vm932_vm3, %v1927_v6 }
 0x296   : > { %1928 = vtanh.f32 %v1096_v7  ;;  %v1359_v7 = vld [vmem:[%s2806_s17 + $0x38] sm:$0xff] }
 0x299   : > { %v1208_v38 = vpop.f32.mrf.mxu3 }
 0x29a   : > { %v1209_v43 = vadd.f32 %v1208_v38, %v1185_v39 }
 0x29c   : > { %v1929_v8 = vpop.eup %1928 }
 0x29d   : > { %1757 = vmatmul.msk.f32.gmra.mxu0 %vm932_vm3, %v1929_v8 }
 0x2a1   : > { %v1211_v51 = vpop.f32.mrf.mxu3 }
 0x2a2   : > { %v1212_v55 = vadd.f32 %v1211_v51, %v1188_v53 }
 0x2a5   : > { %1764 = vmatmul.msk.f32.vlgmr.msra.gmra.mxu0 %vm932_vm3, %v1927_v6  ;;  %v1360_v6 = vld [vmem:[%s2806_s17 + $0x40] sm:$0xff] }
 0x2a6   : > { %1383 = vmatpush.msra.mxu3 %v1360_v6 }
 0x2a8   : > { %1384 = vmatpush.msra.mxu3 %v1359_v7 }
 0x2ad   : > { %1765 = vmatmul.msk.f32.gmra.mxu0 %vm932_vm3, %v1929_v8  ;;  %v1358_v8 = vld [vmem:[%s2806_s17 + $0x30] sm:$0xff] }
 0x2ae   : > { %1385 = vmatpush.msra.mxu3 %v1358_v8 }
 0x312   : > { %v1124_v9 = vpop.f32.mrf.mxu0 }
 0x313   : > { %v1130_v12 = vmul.f32 %v1124_v9, %v2567_v40  ;;  %v1357_v9 = vld [vmem:[%s2806_s17 + $0x28] sm:$0xff] }
 0x314   : > { %1386 = vmatpush.msra.mxu3 %v1357_v9 }
 0x31a   : > { %v1127_v10 = vpop.f32.mrf.mxu0 }
 0x31b   : > { %v1131_v11 = vmul.f32 %v1127_v10, %v2564_v34  ;;  %v1356_v10 = vld [vmem:[%s2806_s17 + $0x20] sm:$0xff] }
 0x31c   : > { %1387 = vmatpush.msra.mxu3 %v1356_v10 }
 0x31d   : > { %1146 = vmatpush.msrb.mxu1 %v1131_v11  ;;  %v1355_v11 = vld [vmem:[%s2806_s17 + $0x18] sm:$0xff] }
 0x31e   : > { %1388 = vmatpush.msra.mxu3 %v1355_v11 }
 0x31f   : > { %1147 = vmatpush.msrb.mxu1 %v1130_v12  ;;  %v1354_v12 = vld [vmem:[%s2806_s17 + $0x10] sm:$0xff] }
 0x320   : > { %1758 = vmatmul.msk.f32.vlgmr.msrb.gmra.mxu1 %vm932_vm3, %v2558_v18  ;;  %v1302_v18 = vld [vmem:[%s2804_s15 + $0x50] sm:$0xff]  ;;  %1389 = vmatpush.msra.mxu3 %v1354_v12 }
 0x321   : > { %1263 = vmatpush.msra.mxu1 %v1242_v13  ;;  %v1353_v13 = vld [vmem:[%s2806_s17 + $0x8] sm:$0xff] }
 0x322   : > { %1390 = vmatpush.msra.mxu3 %v1353_v13  ;;  %v1512_v13 = vld [vmem:[%s2811_s22 + $0x18] sm:$0xff] }
 0x323   : > { %1264 = vmatpush.msra.mxu1 %v1241_v15  ;;  %v1352_v15 = vld [vmem:[%s2806_s17] sm:$0xff] }
 0x324   : > { %1391 = vmatpush.msra.mxu3 %v1352_v15  ;;  %v1511_v15 = vld [vmem:[%s2811_s22 + $0x10] sm:$0xff] }
 0x328   : > { %1759 = vmatmul.msk.f32.gmra.mxu1 %vm932_vm3, %v2552_v14  ;;  %v1303_v14 = vld [vmem:[%s2804_s15 + $0x58] sm:$0xff] }
 0x329   : > { %1321 = vmatpush.msra.mxu2 %v1303_v14  ;;  %v2281_v14 = vmov 0  }
 0x32a   : > { %1909 = vset.pattern.permute.xlu1 %v2281_v14  ;;  %1910 = vset.pattern.permute.xlu2 %v2281_v14 }
 0x32b   : > { %1322 = vmatpush.msra.mxu2 %v1302_v18  ;;  %v1412_v18 = vsel %vm1411_vm13, %v912_v16, 0.0  ;;  %1401 = vperm.xlu1 %1909, %v912_v16   ;;  %v1510_v16 = vld [vmem:[%s2811_s22 + $0x8] sm:$0xff] }
 0x32c   : > { %1911 = vset.pattern.permute.xlu0 %v2281_v14 }
 0x32d   : > { %1323 = vmatpush.msra.mxu2 %v1301_v28 }
 0x32f   : > { %1324 = vmatpush.msra.mxu2 %v1300_v29 }
 0x331   : > { %1325 = vmatpush.msra.mxu2 %v1299_v30 }
 0x333   : > { %1326 = vmatpush.msra.mxu2 %v1298_v31  ;;  %1406 = vperm.xlu1 %1909, %v913_v17  }
 0x335   : > { %1327 = vmatpush.msra.mxu2 %v1297_v32 }
 0x337   : > { %1328 = vmatpush.msra.mxu2 %v1296_v33 }
 0x39d   : > { %v1149_v20 = vpop.f32.mrf.mxu1 }
 0x39e   : > { %v1155_v21 = vmul.f32 %v1149_v20, %v2567_v40  ;;  %v1233_v40 = vpop.f32.mrf.mxu0 }
 0x39f   : > { %v1239_v45 = vadd.f32 %v1233_v40, %v1209_v43  ;;  %v1454_v43 = vld [vmem:[#allocation11 + $0x8] sm:$0xff] }
 0x3a0   : > { %v1161_v22 = vadd.f32 %v1914_v19, %v1155_v21  ;;  %v1916_v21 = vld [vmem:[#allocation7] ss:$0 sm:$0xff]  ;;  %1472 = vmatpush.msrb.mxu0 %v1454_v43 }
 0x3a2   : > { %1930 = vtanh.f32 %v1161_v22 }
 0x3a5   : > { %v1152_v23 = vpop.f32.mrf.mxu1 }
 0x3a6   : > { %v1156_v24 = vmul.f32 %v1152_v23, %v2564_v34  ;;  %v1295_v34 = vld [vmem:[%s2804_s15 + $0x18] sm:$0xff]  ;;  %v1236_v54 = vpop.f32.mrf.mxu0 }
 0x3a7   : > { %1329 = vmatpush.msra.mxu2 %v1295_v34  ;;  %v1240_v57 = vadd.f32 %v1236_v54, %v1212_v55 }
 0x3a8   : > { %v1931_v25 = vpop.eup %1930  ;;  %v1162_v26 = vadd.f32 %v1914_v19, %v1156_v24  ;;  %v1413_v19 = vsel %vm1411_vm13, %v913_v17, 0.0  ;;  %v1509_v17 = vld [vmem:[%s2811_s22] sm:$0xff] }
 0x3a9   : > { %1766 = vmatmul.msk.f32.vlgmr.msra.gmra.mxu1 %vm932_vm3, %v1931_v25  ;;  %1330 = vmatpush.msra.mxu2 %v1294_v35  ;;  %v1414_v20 = vadd.f32 %v1413_v19, %v1412_v18  ;;  %v1501_v19 = vld [vmem:[#allocation13] sm:$0x1] }
 0x3aa   : > { %1932 = vtanh.f32 %v1162_v26 }
 0x3ab   : > { %1331 = vmatpush.msra.mxu2 %v1293_v36  ;;  %v1415_v22 = vrot.slane %v1414_v20, 4 }
 0x3ad   : > { %1332 = vmatpush.msra.mxu2 %v1292_v37  ;;  %v1416_v23 = vadd.f32 %v1415_v22, %v1414_v20 }
 0x3af   : > { %v1417_v26 = vrot.slane %v1416_v23, 2 }
 0x3b0   : > { %v1933_v27 = vpop.eup %1932 }
 0x3b1   : > { %1767 = vmatmul.msk.f32.gmra.mxu1 %vm932_vm3, %v1933_v27  ;;  %v1418_v28 = vadd.f32 %v1417_v26, %v1416_v23 }
 0x3b3   : > { %v1419_v30 = vrot.slane %v1418_v28, 1 }
 0x3b5   : > { %v1420_v31 = vadd.f32 %v1419_v30, %v1418_v28 }
 0x3b7   : > { %vm1421_vm14 = vcmp.lt.f32.partialorder %v1420_v31, 1e-07 }
 0x3b8   : > { %v1422_v34 = vsel %vm1421_vm14, 1.0, %v1420_v31 }
 0x3b9   : > { %1434 = vperm.xlu2 %1910, %v1422_v34  }
 0x413   : > { %v1435_v44 = vpop.permute.xlu2 %1434 }
 0x414   : > { %vm1442_vm1 = vweird.f32 %v1435_v44 }
 0x426   : > { %v1266_v48 = vpop.f32.mrf.mxu1 }
 0x427   : > { %v1272_v49 = vadd.f32 %v1266_v48, %v1239_v45  ;;  %v1452_v45 = vld [vmem:[#allocation10] sm:$0xff] }
 0x428   : > { %1496 = vmatpush.msrb.mxu1 %v1452_v45 }
 0x429   : > { %v1278_v52 = vadd.f32 %v1915_v46, %v1272_v49  ;;  %v1402_v49 = vpop.permute.xlu1 %1401 }
 0x42b   : > { %v1282_v56 = vmin.f32 %v1278_v52, 0.0  ;;  %vm1280_vm11 = vcmp.gt.f32.partialorder %v1278_v52, 0.0 }
 0x42d   : > { %v1284_v58 = vmul.f32 1.442695, %v1282_v56 }
 0x42e   : > { %v1269_v59 = vpop.f32.mrf.mxu1 }
 0x42f   : > { %1934 = vpow2.f32 %v1284_v58  ;;  %v1273_v60 = vadd.f32 %v1269_v59, %v1240_v57 }
 0x431   : > { %v1279_v61 = vadd.f32 %v1915_v46, %v1273_v60  ;;  %v1453_v46 = vld [vmem:[#allocation11] sm:$0xff]  ;;  %v1407_v57 = vpop.permute.xlu1 %1406 }
 0x432   : > { %1473 = vmatpush.msrb.mxu0 %v1453_v46 }
 0x433   : > { %v1283_v62 = vmin.f32 %v1279_v61, 0.0  ;;  %vm1281_vm12 = vcmp.gt.f32.partialorder %v1279_v61, 0.0  ;;  %1776 = vmatmul.msk.f32.vlgmr.msrb.gmra.mxu0 %vm932_vm3, %v914_v47 }
 0x434   : > { %1530 = vmatpush.msra.mxu0 %v1512_v13 }
 0x435   : > { %v1935_v63 = vpop.eup %1934  ;;  %v1286_v0 = vmul.f32 1.442695, %v1283_v62 }
 0x436   : > { %v1768_v1 = vadd.f32 -1.0, %v1935_v63  ;;  %1531 = vmatpush.msra.mxu0 %v1511_v15 }
 0x437   : > { %1936 = vpow2.f32 %v1286_v0 }
 0x438   : > { %v1290_v2 = vsel %vm1280_vm11, %v1278_v52, %v1768_v1  ;;  %1532 = vmatpush.msra.mxu0 %v1510_v16 }
 0x439   : > { %1770 = vmatmul.msk.f32.vlgmr.msra.gmra.mxu2 %vm1310_vm10, %v1290_v2  ;;  %v1448_v2 = vand.u32 2147483648, %v1435_v44 }
 0x43a   : > { %1533 = vmatpush.msra.mxu0 %v1509_v17 }
 0x43b   : > { %v1449_v7 = vor.u32 1.1754944e-38, %v1448_v2 }
 0x43d   : > { %v1937_v3 = vpop.eup %1936 }
 0x43e   : > { %v1769_v4 = vadd.f32 -1.0, %v1937_v3 }
 0x440   : > { %v1291_v5 = vsel %vm1281_vm12, %v1279_v61, %v1769_v4 }
 0x441   : > { %1771 = vmatmul.msk.f32.gmra.mxu2 %vm1310_vm10, %v1291_v5  ;;  %v1446_v5 = vand.u32 2147483647, %v1435_v44 }
 0x443   : > { %vm1447_vm5 = vcmp.eq.f32.partialorder %v1446_v5, 8.507059e+37 }
 0x4b0   : > { %v1475_v14 = vpop.f32.mrf.mxu0 }
 0x4bc   : > { %v1334_v24 = vpop.f32.mrf.mxu2 }
 0x4bd   : > { %v1335_v25 = vadd.f32 %v1916_v21, %v1334_v24 }
 0x4bf   : > { %v1342_v27 = vmin.f32 %v1335_v25, 0.0  ;;  %vm1340_vm15 = vcmp.gt.f32.partialorder %v1335_v25, 0.0 }
 0x4c1   : > { %v1344_v29 = vmul.f32 1.442695, %v1342_v27  ;;  %v1513_v27 = vld [vmem:[#allocation14] sm:$0x1] }
 0x4c3   : > { %1938 = vpow2.f32 %v1344_v29 }
 0x4c4   : > { %v1337_v32 = vpop.f32.mrf.mxu2 }
 0x4c5   : > { %v1338_v33 = vadd.f32 %v1916_v21, %v1337_v32 }
 0x4c7   : > { %v1343_v35 = vmin.f32 %v1338_v33, 0.0  ;;  %vm1341_vm0 = vcmp.gt.f32.partialorder %v1338_v33, 0.0 }
 0x4c9   : > { %v1939_v36 = vpop.eup %1938  ;;  %v1346_v37 = vmul.f32 1.442695, %v1343_v35 }
 0x4ca   : > { %v1772_v38 = vadd.f32 -1.0, %v1939_v36 }
 0x4cb   : > { %1940 = vpow2.f32 %v1346_v37 }
 0x4cc   : > { %v1350_v39 = vsel %vm1340_vm15, %v1335_v25, %v1772_v38  ;;  %1942 = vrcp.f32 %v1435_v44 }
 0x4cd   : > { %1774 = vmatmul.msk.f32.vlgmr.msra.gmra.mxu3 %vm1310_vm10, %v1350_v39 }
 0x4d1   : > { %v1941_v40 = vpop.eup %1940 }
 0x4d2   : > { %v1773_v41 = vadd.f32 -1.0, %v1941_v40  ;;  %v1943_v51 = vpop.eup %1942 }
 0x4d3   : > { %v1438_v54 = vmul.f32 %v1943_v51, %v1435_v44  ;;  %vm1443_vm3 = vweird.f32 %v1943_v51 }
 0x4d4   : > { %v1351_v42 = vsel %vm1341_vm0, %v1338_v33, %v1773_v41  ;;  %vm1444_vm4 = vmor %vm1442_vm1, %vm1443_vm3 }
 0x4d5   : > { %1775 = vmatmul.msk.f32.gmra.mxu3 %vm1310_vm10, %v1351_v42  ;;  %v1439_v59 = vsub.f32 1.0, %v1438_v54 }
 0x4d7   : > { %v1440_v0 = vmul.f32 %v1943_v51, %v1439_v59 }
 0x4d9   : > { %v1441_v4 = vadd.f32 %v1943_v51, %v1440_v0 }
 0x4db   : > { %v1445_v9 = vsel %vm1444_vm4, %v1943_v51, %v1441_v4 }
 0x4dc   : > { %v1450_v11 = vsel %vm1447_vm5, %v1449_v7, %v1445_v9 }
 0x550   : > { %v1393_v48 = vpop.f32.mrf.mxu3 }
 0x551   : > { %v1394_v52 = vadd.f32 %v1917_v50, %v1393_v48 }
 0x553   : > { %v1409_v55 = vmul.f32 %v1402_v49, %v1394_v52 }
 0x555   : > { %v1423_v60 = vsel %vm962_vm2, %v1409_v55, 0.0 }
 0x558   : > { %v1396_v53 = vpop.f32.mrf.mxu3 }
 0x559   : > { %v1397_v56 = vadd.f32 %v1917_v50, %v1396_v53 }
 0x55b   : > { %v1410_v58 = vmul.f32 %v1407_v57, %v1397_v56 }
 0x55d   : > { %v1424_v61 = vsel %vm962_vm2, %v1410_v58, 0.0 }
 0x55e   : > { %v1425_v62 = vadd.f32 %v1424_v61, %v1423_v60 }
 0x560   : > { %v1426_v63 = vrot.slane %v1425_v62, 4 }
 0x562   : > { %v1427_v1 = vadd.f32 %v1426_v63, %v1425_v62 }
 0x564   : > { %v1428_v3 = vrot.slane %v1427_v1, 2 }
 0x566   : > { %v1429_v6 = vadd.f32 %v1428_v3, %v1427_v1 }
 0x568   : > { %v1430_v8 = vrot.slane %v1429_v6, 1 }
 0x56a   : > { %v1431_v10 = vadd.f32 %v1430_v8, %v1429_v6 }
 0x56c   : > { %v1451_v12 = vmul.f32 %v1450_v11, %v1431_v10 }
 0x56e   : > { %1777 = vmatmul.msk.f32.vlgmr.msrb.gmra.mxu1 %vm962_vm2, %v1451_v12  ;;  %vm1514_vm2 = vcmask 261120  }
 0x5eb   : > { %v1498_v18 = vpop.f32.mrf.mxu1 }
 0x5ec   : > { %v1499_v20 = vadd.f32 %v1498_v18, %v1475_v14 }
 0x5ee   : > { %v1502_v21 = vadd.f32 %v1501_v19, %v1499_v20 }
 0x5f0   : > { %v1504_v22 = vmin.f32 %v1502_v21, 0.0  ;;  %vm1503_vm6 = vcmp.gt.f32.partialorder %v1502_v21, 0.0 }
 0x5f2   : > { %v1505_v23 = vmul.f32 1.442695, %v1504_v22 }
 0x5f4   : > { %1944 = vpow2.f32 %v1505_v23 }
 0x5fa   : > { %v1945_v24 = vpop.eup %1944 }
 0x5fb   : > { %v1778_v25 = vadd.f32 -1.0, %v1945_v24 }
 0x5fd   : > { %v1508_v26 = vsel %vm1503_vm6, %v1502_v21, %v1778_v25 }
 0x5fe   : > { %1779 = vmatmul.msk.f32.vlgmr.msra.gmra.mxu0 %vm1514_vm2, %v1508_v26 }
 0x67b   : > { %v1535_v28 = vpop.f32.mrf.mxu0 }
 0x67c   : > { %v1536_v29 = vadd.f32 %v1535_v28, %v1513_v27 }
 0x67e   : > { %1539 = vst.msk [vmem:[%s889_s2] sm:$0x1] %vm1538_vm7, %v1536_v29 }
 0x67f   : > { %2213 = shalt.err (!%p2210_p8)
}
 0x680   : > { %1817 = dma.vmem_to_hbm [thread:$0]  (%p2445_p5), %s1552_s25, 16, %s1554_s1, %s1541_s0  }
 0x681 PF: > { %s2863_s24 = sld [smem:[#allocation25_spill]] }
 0x682   : > { %s2864_s4 = sld [smem:[#allocation23_spill]] }
 0x687   : > { %p1864_p9 = scmp.ge.s32.totalorder %s2863_s24, 2 }
 0x688   : > { %s1565_s2 = sand.u32 1, %s2864_s4  }
 0x689   : > { %p1845_p10 = pnand %p1864_p9, %p2449_p6  ;;  %s1566_s6 = scalar_lea.sflag [#allocation4], %s1565_s2 }
 0x68b   : > { %p1846_p11 = pneg %p1845_p10 }
 0x68d   : > { %2251 = dma.done.wait (%p1846_p11), %s1566_s6, 16  }
 0x68e   : > { %2253 = vsyncadd (%p1846_p11), %s1566_s6, 4294967280  ;;  %s2866_s28 = sld [smem:[#allocation26_spill]]  ;;  %s2869_s5 = smov %s2260_s26 }
 0x68f   : > { %s2867_s29 = sld [smem:[#allocation24_spill]] }
 0x690   : > { %s2868_s27 = sld [smem:[#allocation27_spill]] }
 0x694   : > { %p39_p12 = scmp.ge.s32.totalorder %s2866_s28, 4  }
 0x695   : > { %s2870_s26 = smov %s2867_s29 }
 0x696   :  { %41 = sbr.rel (!%p39_p12) target bundleno = 22 (0x16), region = 193 }
 0x69b   :  { %1571 = vsyncpa [#allocation3], 1 }
 0x69c   :  { %1573 = vsyncpa [#allocation3 + $0x1], 1 }
 0x69d   :  { %1574 = vsyncpa [#allocation6], 1 }
 0x69e   :  { %1575 = vsyncpa [#allocation9], 1 }
 0x69f   :  { %1576 = vsyncpa [#allocation12], 1 }
 0x6a0   :  { %1577 = vsyncpa [#allocation15], 1 }
 0x6a1   :  { %1578 = vsyncpa [#allocation4], 1 }
 0x6a2   :  { %1580 = vsyncpa [#allocation4 + $0x1], 1 }

</bundles_post_ra>
